<compile_context>
chip_gen: v5e
topology: v5e:2x2
jax: 0.10.0
libtpu: 0.0.40
codegen_flags: <defaults>
</compile_context>

<pallas_src>
import functools

import jax
import jax.numpy as jnp
from jax.experimental import pallas as pl
from jax.experimental.pallas import tpu as pltpu


_TARGET_BLOCK_BYTES = 4 * 1024 * 1024        # ~4 MiB per array per block
_WHOLE_MATRIX_MAX_BYTES = 4 * 1024 * 1024    # switch to 2-D tiling above this


# ---------------------------------------------------------------------------
# Kernels
# ---------------------------------------------------------------------------
def _skew_whole_kernel(x_ref, o_ref, *, lower: bool):
    """Block = (TB, N, N): whole matrices, batched over the leading dim."""
    x = x_ref[...]                                           # (TB, N, N)
    n = x.shape[-1]
    row = jax.lax.broadcasted_iota(jnp.int32, (n, n), 0)
    col = jax.lax.broadcasted_iota(jnp.int32, (n, n), 1)
    keep = (row > col) if lower else (row < col)             # strict triangle
    zero = jnp.zeros((), dtype=x.dtype)
    l = jnp.where(keep, x, zero)                             # mask broadcast over batch
    o_ref[...] = l - jnp.swapaxes(l, -2, -1)                 # L - L^T (tile-local transpose)


def _skew_tiled_kernel(x_ref, xt_ref, o_ref, *, lower: bool, t: int):
    """Block = (TB, T, T) spatial tile (m, k); xt_ref holds tile (k, m)."""
    m = pl.program_id(1)
    k = pl.program_id(2)
    r = jax.lax.broadcasted_iota(jnp.int32, (t, t), 0)
    c = jax.lax.broadcasted_iota(jnp.int32, (t, t), 1)
    # L tile at (m, k): global rows m*t+r, cols k*t+c.
    row_mk, col_mk = m * t + r, k * t + c
    keep_mk = (row_mk > col_mk) if lower else (row_mk < col_mk)
    # L tile at (k, m): global rows k*t+r, cols m*t+c.
    row_km, col_km = k * t + r, m * t + c
    keep_km = (row_km > col_km) if lower else (row_km < col_km)

    x = x_ref[...]                                           # X[m-tile, k-tile]
    xt = xt_ref[...]                                         # X[k-tile, m-tile]
    zero = jnp.zeros((), dtype=x.dtype)
    l_mk = jnp.where(keep_mk, x, zero)
    l_km = jnp.where(keep_km, xt, zero)
    o_ref[...] = l_mk - jnp.swapaxes(l_km, -2, -1)           # out[m,k] = L[m,k] - L[k,m]^T


# ---------------------------------------------------------------------------
# pallas_call wrappers
# ---------------------------------------------------------------------------
def _skew_whole(xb: jax.Array, lower: bool, *, block_batch=None) -> jax.Array:
    b, n, _ = xb.shape
    itemsize = xb.dtype.itemsize
    mat_bytes = n * n * itemsize
    if block_batch is None:
        block_batch = max(1, min(b, _TARGET_BLOCK_BYTES // mat_bytes))
    tb = int(block_batch)
    block_bytes = tb * mat_bytes
    # in + out, double-buffered, plus headroom.
    vmem_limit = int(min(48 * 2**20, max(32 * 2**20, 6 * block_bytes)))

    kernel = functools.partial(_skew_whole_kernel, lower=lower)
    return pl.pallas_call(
        kernel,
        out_shape=jax.ShapeDtypeStruct((b, n, n), xb.dtype),
        grid_spec=pltpu.PrefetchScalarGridSpec(
            num_scalar_prefetch=0,
            grid=(pl.cdiv(b, tb),),
            in_specs=[pl.BlockSpec((tb, n, n), lambda i: (i, 0, 0))],
            out_specs=pl.BlockSpec((tb, n, n), lambda i: (i, 0, 0)),
        ),
        compiler_params=pltpu.CompilerParams(
            dimension_semantics=("parallel",),
            vmem_limit_bytes=vmem_limit),
        cost_estimate=pl.CostEstimate(
            flops=2 * b * n * n,
            transcendentals=0,
            bytes_accessed=2 * b * n * n * itemsize),
    )(xb)


def _skew_tiled(xb: jax.Array, lower: bool, *, tile: int = 512,
                block_batch=None) -> jax.Array:
    """Large-N path: 2-D spatial tiling; X is read twice (once transposed-indexed)."""
    b, n, _ = xb.shape
    itemsize = xb.dtype.itemsize
    t = int(min(tile, n))                        # t==n or t a multiple of (8,128)
    tile_bytes = t * t * itemsize
    if block_batch is None:
        block_batch = max(1, min(b, _TARGET_BLOCK_BYTES // tile_bytes))
    tb = int(block_batch)
    block_bytes = tb * tile_bytes
    # 2 inputs + 1 output, double-buffered, plus headroom.
    vmem_limit = int(min(48 * 2**20, max(32 * 2**20, 8 * block_bytes)))

    kernel = functools.partial(_skew_tiled_kernel, lower=lower, t=t)
    grid = (pl.cdiv(b, tb), pl.cdiv(n, t), pl.cdiv(n, t))
    return pl.pallas_call(
        kernel,
        out_shape=jax.ShapeDtypeStruct((b, n, n), xb.dtype),
        grid_spec=pltpu.PrefetchScalarGridSpec(
            num_scalar_prefetch=0,
            grid=grid,
            in_specs=[
                pl.BlockSpec((tb, t, t), lambda i, m, k: (i, m, k)),
                pl.BlockSpec((tb, t, t), lambda i, m, k: (i, k, m)),
            ],
            out_specs=pl.BlockSpec((tb, t, t), lambda i, m, k: (i, m, k)),
        ),
        compiler_params=pltpu.CompilerParams(
            dimension_semantics=("parallel", "parallel", "parallel"),
            vmem_limit_bytes=vmem_limit),
        cost_estimate=pl.CostEstimate(
            flops=2 * b * n * n,
            transcendentals=0,
            bytes_accessed=3 * b * n * n * itemsize),
    )(xb, xb)


def skew(x: jax.Array, lower: bool = True) -> jax.Array:
    """Apply the Skew parametrization to a batch of square matrices.

    Args:
      x: array of shape (..., N, N).
      lower: use the strictly lower (True) or upper (False) triangular part.
    Returns:
      skew-symmetric matrices, same shape/dtype as x.
    """
    if x.ndim < 2:
        raise ValueError(
            "Cannot instantiate Skew on a tensor of less than 2 dimensions. "
            f"Got a tensor of size {x.shape}")
    if x.shape[-2] != x.shape[-1]:
        raise ValueError(
            "The Skew parametrization can just be applied to square matrices. "
            f"Got a tensor of size {x.shape}")

    orig_shape = x.shape
    n = x.shape[-1]
    xb = x.reshape((-1, n, n))                   # flatten leading dims (glue)
    mat_bytes = n * n * xb.dtype.itemsize

    if mat_bytes <= _WHOLE_MATRIX_MAX_BYTES:
        out = _skew_whole(xb, lower)
    else:
        out = _skew_tiled(xb, lower)
    return out.reshape(orig_shape)


# ---------------------------------------------------------------------------
# Reference + tests
# ---------------------------------------------------------------------------
def _skew_ref(x, lower=True):
    """Pure-JAX reference mirroring the PyTorch semantics."""
    a = jnp.tril(x, -1) if lower else jnp.triu(x, 1)
    return a - jnp.swapaxes(a, -2, -1)


if __name__ == "__main__":
    key = jax.random.PRNGKey(0)
    k1, k2, k3, k4 = jax.random.split(key, 4)

    # 1) Small module-style shape with extra leading dims (primary case).
    x1 = jax.random.normal(k1, (2, 4, 16, 16), dtype=jnp.float32)
    out1 = jax.block_until_ready(skew(x1, lower=True))
    assert out1.shape == x1.shape and out1.dtype == x1.dtype
    assert jnp.allclose(out1, _skew_ref(x1, True), atol=1e-6)
    assert jnp.allclose(out1, -jnp.swapaxes(out1, -2, -1), atol=1e-6)
    out1u = jax.block_until_ready(skew(x1, lower=False))
    assert jnp.allclose(out1u, _skew_ref(x1, False), atol=1e-6)

    # 2) Single 2-D matrix (no batch dims).
    x2 = jax.random.normal(k2, (16, 16), dtype=jnp.float32)
    out2 = jax.block_until_ready(skew(x2, lower=True))
    assert out2.shape == x2.shape
    assert jnp.allclose(out2, _skew_ref(x2, True), atol=1e-6)

    # 3) Lane-dense, batched whole-matrix path (N multiple of 128) +
    #    batch-block clipping (b not a multiple of the batch block).
    x3 = jax.random.normal(k3, (4, 128, 128), dtype=jnp.float32)
    out3 = jax.block_until_ready(skew(x3, lower=True))
    assert jnp.allclose(out3, _skew_ref(x3, True), atol=1e-6)
    out3c = jax.block_until_ready(_skew_whole(x3, True, block_batch=3))
    assert jnp.allclose(out3c, _skew_ref(x3, True), atol=1e-6)

    # 4) 2-D spatially tiled large-N path (exercised with a small tile for speed).
    x4 = jax.random.normal(k4, (2, 256, 256), dtype=jnp.float32)
    out4 = jax.block_until_ready(_skew_tiled(x4, True, tile=128))
    assert jnp.allclose(out4, _skew_ref(x4, True), atol=1e-6)
    out4u = jax.block_until_ready(_skew_tiled(x4, False, tile=128))
    assert jnp.allclose(out4u, _skew_ref(x4, False), atol=1e-6)

    print("KERNEL_OK")
</pallas_src>

<mosaic_0001>
module attributes {stable_mosaic.version = 11 : i64} {
  func.func @_skew_whole_kernel(%arg0: i32, %arg1: memref<8x16x16xf32, #tpu.memory_space<vmem>>, %arg2: memref<8x16x16xf32, #tpu.memory_space<vmem>>) attributes {dimension_semantics = [#tpu.dimension_semantics<parallel>], iteration_bounds = array<i64: 1>, scalar_prefetch = 0 : i64, scratch_operands = 0 : i64, tpu.core_type = #tpu.core_type<tc>, window_params = [{transform_indices = @transform_0, window_bounds = array<i64: 8, 16, 16>}, {transform_indices = @transform_1, window_bounds = array<i64: 8, 16, 16>}]} {
    %c0 = arith.constant 0 : index
    %c0_0 = arith.constant 0 : index
    %c0_1 = arith.constant 0 : index
    %0 = vector.load %arg1[%c0, %c0_0, %c0_1] : memref<8x16x16xf32, #tpu.memory_space<vmem>>, vector<8x16x16xf32>
    %1 = tpu.iota {dimensions = array<i32: 0>} : vector<16x16xi32>
    %2 = tpu.iota {dimensions = array<i32: 1>} : vector<16x16xi32>
    %3 = arith.cmpi sgt, %1, %2 : vector<16x16xi32>
    %cst = arith.constant 0.000000e+00 : f32
    %4 = vector.shape_cast %3 : vector<16x16xi1> to vector<1x16x16xi1>
    %5 = vector.broadcast %4 : vector<1x16x16xi1> to vector<8x16x16xi1>
    %6 = vector.broadcast %cst : f32 to vector<8x16x16xf32>
    %7 = arith.select %5, %0, %6 : vector<8x16x16xi1>, vector<8x16x16xf32>
    %8 = tpu.transpose %7, [0, 2, 1] : vector<8x16x16xf32> -> vector<8x16x16xf32>
    %9 = arith.subf %7, %8 : vector<8x16x16xf32>
    %c0_2 = arith.constant 0 : index
    %c0_3 = arith.constant 0 : index
    %c0_4 = arith.constant 0 : index
    %10 = vector.load %arg2[%c0_2, %c0_3, %c0_4] : memref<8x16x16xf32, #tpu.memory_space<vmem>>, vector<8x16x16xf32>
    tpu.vector_store %arg2[%c0_2, %c0_3, %c0_4], %9 {strides = array<i32>} : memref<8x16x16xf32, #tpu.memory_space<vmem>>, vector<8x16x16xf32>,
    return
  }
  func.func @transform_0(%arg0: i32) -> (i32, i32, i32) {
    %c0_i32 = arith.constant 0 : i32
    %c0_i32_0 = arith.constant 0 : i32
    %c0_i32_1 = arith.constant 0 : i32
    return %arg0, %c0_i32, %c0_i32_0 : i32, i32, i32
  }
  func.func @transform_1(%arg0: i32) -> (i32, i32, i32) {
    %c0_i32 = arith.constant 0 : i32
    %c0_i32_0 = arith.constant 0 : i32
    %c0_i32_1 = arith.constant 0 : i32
    return %arg0, %c0_i32, %c0_i32_0 : i32, i32, i32
  }
}

</mosaic_0001>

<bundles_post_ra>
// kernel: tpu_custom_call.1
= control target key start
LH: loop header
LB: loop body
LE: loop exit
PB: predicated region body
PF: predicated region fallthrough
CT: control target
= control target key end

     0   :  { %6 = vsyncpa [#allocation3], 0  ;;  %s515_s0 = inlined_call_operand.hbm [shape: f32[8,16,16], index: 0, kind: input, shape index: {}]   ;;  %s516_s1 = inlined_call_operand.hbm [shape: f32[8,16,16], index: 1, kind: output, shape index: {}]  }
   0x1   :  { %7 = vsyncpa [#allocation4], 0  ;;  %s12_s8 = sshll.u32 %s515_s0, 4  ;;  %s433_s9 = smov [#allocation2]   ;;  %s13_s8 = int_to_ptr.hbm [resolvable:$true] %s12_s8 }
   0x2   :  { %s14_s10 = sshll.u32 %s433_s9, 4  ;;  %s434_s11 = smov 128   ;;  %s15_s10 = int_to_ptr.vmem [resolvable:$true] %s14_s10 }
   0x3   :  { %s435_s12 = smov 8  }
   0x4   :  { %20 = dma.hbm_to_vmem [thread:$0]  %s13_s8, 2048, %s15_s10, [#allocation3], %s434_s11, %s434_s11, %s435_s12  }
   0x5   :  { %429 = dma.done.wait [#allocation3], 2048  }
   0x6   :  { %430 = vsyncadd [#allocation3], 4294965248  ;;  %v41_v0 = vlaneseq  ;;  %v27_v4 = vld [vmem:[#allocation2 + $0x10] sm:$0xff]  ;;  %v25_v5 = vld [vmem:[#allocation2] sm:$0xff]  ;;  %vm340_vm2 = vcmask 130048   ;;  %s436_s0 = smov [#allocation5]  }
   0x7   :  { %v29_v9 = vld [vmem:[#allocation2 + $0x20] sm:$0xff]  ;;  %v28_v10 = vld [vmem:[#allocation2 + $0x18] sm:$0xff]  ;;  %v26_v12 = vld [vmem:[#allocation2 + $0x8] sm:$0xff]  ;;  %s361_s13 = sshll.u32 %s436_s0, 4  ;;  %s363_s16 = sshll.u32 %s516_s1, 4  ;;  %s362_s13 = int_to_ptr.vmem [resolvable:$true] %s361_s13  ;;  %s364_s16 = int_to_ptr.hbm [resolvable:$true] %s363_s16 }
   0x8   :  { %v42_v1 = vshrl.u32 %v41_v0, 7  ;;  %v45_v2 = vand.u32 127, %v41_v0  ;;  %v30_v16 = vld [vmem:[#allocation2 + $0x28] sm:$0xff]  ;;  %v33_v18 = vld [vmem:[#allocation2 + $0x40] sm:$0xff]  ;;  %v31_v19 = vld [vmem:[#allocation2 + $0x30] sm:$0xff] }
   0x9   :  { %v35_v22 = vld [vmem:[#allocation2 + $0x50] sm:$0xff]  ;;  %v34_v24 = vld [vmem:[#allocation2 + $0x48] sm:$0xff]  ;;  %v32_v25 = vld [vmem:[#allocation2 + $0x38] sm:$0xff] }
   0xa   :  { %vm453_vm0 = vcmp.gt.s32.totalorder %v42_v1, %v45_v2  ;;  %v43_v6 = vadd.s32 8, %v42_v1  ;;  %v36_v28 = vld [vmem:[#allocation2 + $0x58] sm:$0xff]  ;;  %v39_v30 = vld [vmem:[#allocation2 + $0x70] sm:$0xff]  ;;  %v37_v31 = vld [vmem:[#allocation2 + $0x60] sm:$0xff] }
   0xb   :  { %v54_v7 = vsel %vm453_vm0, %v27_v4, 0.0  ;;  %v52_v8 = vsel %vm453_vm0, %v25_v5, 0.0  ;;  %v56_v13 = vsel %vm453_vm0, %v29_v9, 0.0  ;;  %v60_v20 = vsel %vm453_vm0, %v33_v18, 0.0  ;;  %v40_v34 = vld [vmem:[#allocation2 + $0x78] sm:$0xff]  ;;  %v38_v35 = vld [vmem:[#allocation2 + $0x68] sm:$0xff] }
   0xc   :  { %100 = vxpose.xlu1.b32.start [1/2] (short) (narrow) %v54_v7, 16  ;;  %68 = vxpose.xlu0.b32.start [1/2] (short) (narrow) %v52_v8, 16  ;;  %vm461_vm1 = vcmp.gt.s32.totalorder %v43_v6, %v45_v2  ;;  %v58_v21 = vsel %vm453_vm0, %v31_v19, 0.0  ;;  %v62_v23 = vsel %vm453_vm0, %v35_v22, 0.0  ;;  %v66_v32 = vsel %vm453_vm0, %v39_v30, 0.0 }
   0xd   :  { %132 = vxpose.xlu2.b32.start [1/2] (short) (narrow) %v56_v13, 16  ;;  %v55_v14 = vsel %vm461_vm1, %v28_v10, 0.0  ;;  %v53_v15 = vsel %vm461_vm1, %v26_v12, 0.0  ;;  %v57_v17 = vsel %vm461_vm1, %v30_v16, 0.0  ;;  %v61_v26 = vsel %vm461_vm1, %v34_v24, 0.0 }
   0xe   :  { %v59_v27 = vsel %vm461_vm1, %v32_v25, 0.0  ;;  %v63_v29 = vsel %vm461_vm1, %v36_v28, 0.0  ;;  %v64_v33 = vsel %vm453_vm0, %v37_v31, 0.0  ;;  %v67_v36 = vsel %vm461_vm1, %v40_v34, 0.0 }
   0xf   :  { %v65_v37 = vsel %vm461_vm1, %v38_v35, 0.0 }
  0x14   :  { %101 = vxpose.xlu1.b32.end [2/2] (short) (narrow) %v55_v14, 16  ;;  %69 = vxpose.xlu0.b32.end [2/2] (short) (narrow) %v53_v15, 16 }
  0x15   :  { %133 = vxpose.xlu2.b32.end [2/2] (short) (narrow) %v57_v17, 16 }
  0x1c   :  { %196 = vxpose.xlu1.b32.start [1/2] (short) (narrow) %v60_v20, 16  ;;  %164 = vxpose.xlu0.b32.start [1/2] (short) (narrow) %v58_v21, 16 }
  0x1d   :  { %228 = vxpose.xlu2.b32.start [1/2] (short) (narrow) %v62_v23, 16 }
  0x24   :  { %197 = vxpose.xlu1.b32.end [2/2] (short) (narrow) %v61_v26, 16  ;;  %165 = vxpose.xlu0.b32.end [2/2] (short) (narrow) %v59_v27, 16 }
  0x25   :  { %229 = vxpose.xlu2.b32.end [2/2] (short) (narrow) %v63_v29, 16 }
  0x2c   :  { %292 = vxpose.xlu1.b32.start [1/2] (short) (narrow) %v66_v32, 16  ;;  %260 = vxpose.xlu0.b32.start [1/2] (short) (narrow) %v64_v33, 16 }
  0x34   :  { %293 = vxpose.xlu1.b32.end [2/2] (short) (narrow) %v67_v36, 16  ;;  %261 = vxpose.xlu0.b32.end [2/2] (short) (narrow) %v65_v37, 16 }
  0xa6   :  { %v148_v38 = vpop.trf.xlu2 }
  0xa7   :  { %v328_v39 = vsub.f32 %v56_v13, %v148_v38 }
  0xa9   :  { %345 = vst.msk [vmem:[#allocation5 + $0x20] sm:$0xff] %vm340_vm2, %v328_v39 }
  0xae   :  { %v149_v44 = vpop.trf.xlu2 }
  0xaf   :  { %v329_v45 = vsub.f32 %v57_v17, %v149_v44 }
  0xb0   :  { %v116_v40 = vpop.trf.xlu1  ;;  %v84_v41 = vpop.trf.xlu0 }
  0xb1   :  { %v326_v42 = vsub.f32 %v54_v7, %v116_v40  ;;  %v324_v43 = vsub.f32 %v52_v8, %v84_v41  ;;  %346 = vst.msk [vmem:[#allocation5 + $0x28] sm:$0xff] %vm340_vm2, %v329_v45 }
  0xb3   :  { %343 = vst.msk [vmem:[#allocation5 + $0x10] sm:$0xff] %vm340_vm2, %v326_v42 }
  0xb4   :  { %341 = vst.msk [vmem:[#allocation5] sm:$0xff] %vm340_vm2, %v324_v43 }
  0xb6   :  { %v244_v50 = vpop.trf.xlu2 }
  0xb7   :  { %v334_v51 = vsub.f32 %v62_v23, %v244_v50 }
  0xb8   :  { %v117_v46 = vpop.trf.xlu1  ;;  %v85_v47 = vpop.trf.xlu0 }
  0xb9   :  { %v327_v48 = vsub.f32 %v55_v14, %v117_v46  ;;  %v325_v49 = vsub.f32 %v53_v15, %v85_v47  ;;  %351 = vst.msk [vmem:[#allocation5 + $0x50] sm:$0xff] %vm340_vm2, %v334_v51 }
  0xbb   :  { %344 = vst.msk [vmem:[#allocation5 + $0x18] sm:$0xff] %vm340_vm2, %v327_v48 }
  0xbc   :  { %342 = vst.msk [vmem:[#allocation5 + $0x8] sm:$0xff] %vm340_vm2, %v325_v49 }
  0xbe   :  { %v245_v56 = vpop.trf.xlu2 }
  0xbf   :  { %v335_v57 = vsub.f32 %v63_v29, %v245_v56 }
  0xc0   :  { %v212_v52 = vpop.trf.xlu1  ;;  %v180_v53 = vpop.trf.xlu0 }
  0xc1   :  { %v332_v54 = vsub.f32 %v60_v20, %v212_v52  ;;  %v330_v55 = vsub.f32 %v58_v21, %v180_v53  ;;  %352 = vst.msk [vmem:[#allocation5 + $0x58] sm:$0xff] %vm340_vm2, %v335_v57 }
  0xc3   :  { %349 = vst.msk [vmem:[#allocation5 + $0x40] sm:$0xff] %vm340_vm2, %v332_v54 }
  0xc4   :  { %347 = vst.msk [vmem:[#allocation5 + $0x30] sm:$0xff] %vm340_vm2, %v330_v55 }
  0xc8   :  { %v213_v58 = vpop.trf.xlu1  ;;  %v181_v59 = vpop.trf.xlu0 }
  0xc9   :  { %v333_v60 = vsub.f32 %v61_v26, %v213_v58  ;;  %v331_v61 = vsub.f32 %v59_v27, %v181_v59 }
  0xcb   :  { %350 = vst.msk [vmem:[#allocation5 + $0x48] sm:$0xff] %vm340_vm2, %v333_v60 }
  0xcc   :  { %348 = vst.msk [vmem:[#allocation5 + $0x38] sm:$0xff] %vm340_vm2, %v331_v61 }
  0xd0   :  { %v308_v62 = vpop.trf.xlu1  ;;  %v276_v63 = vpop.trf.xlu0 }
  0xd1   :  { %v338_v0 = vsub.f32 %v66_v32, %v308_v62  ;;  %v336_v1 = vsub.f32 %v64_v33, %v276_v63 }
  0xd3   :  { %355 = vst.msk [vmem:[#allocation5 + $0x70] sm:$0xff] %vm340_vm2, %v338_v0 }
  0xd4   :  { %353 = vst.msk [vmem:[#allocation5 + $0x60] sm:$0xff] %vm340_vm2, %v336_v1 }
  0xd8   :  { %v309_v2 = vpop.trf.xlu1  ;;  %v277_v3 = vpop.trf.xlu0 }
  0xd9   :  { %v339_v4 = vsub.f32 %v67_v36, %v309_v2  ;;  %v337_v5 = vsub.f32 %v65_v37, %v277_v3 }
  0xdb   :  { %356 = vst.msk [vmem:[#allocation5 + $0x78] sm:$0xff] %vm340_vm2, %v339_v4 }
  0xdc   :  { %354 = vst.msk [vmem:[#allocation5 + $0x68] sm:$0xff] %vm340_vm2, %v337_v5 }
  0xdd   :  { %369 = dma.vmem_to_hbm [thread:$0]  %s362_s13, 2048, %s364_s16, [#allocation4], %s434_s11, %s434_s11, %s435_s12  }
  0xde   :  { %431 = dma.done.wait [#allocation4], 2048  }
  0xdf   :  { %432 = vsyncadd [#allocation4], 4294965248 }
  0xe0   :  { %374 = vsyncpa [#allocation3], 1 }
  0xe1   :  { %375 = vsyncpa [#allocation4], 1 }

</bundles_post_ra>
